<compile_context>
chip_gen: v6e
topology: v6e:2x2x1
jax: 0.10.0
libtpu: 0.0.40
codegen_flags: <defaults>
</compile_context>

<pallas_src>
import numpy as np
import jax
import jax.numpy as jnp
from jax.experimental import pallas as pl
from jax.experimental.pallas import tpu as pltpu


def _round_up(x, m):
    return ((x + m - 1) // m) * m


def _wdk_matmul_kernel(f1_ref, f2_ref, o_ref, acc_ref):
    """K tile = F1_tile @ F2_tile  (bf16 operands, f32 accumulation)."""
    @pl.when(pl.program_id(2) == 0)
    def _init():
        acc_ref[...] = jnp.zeros_like(acc_ref)

    acc_ref[...] += jnp.dot(f1_ref[...], f2_ref[...],
                            preferred_element_type=jnp.float32)

    @pl.when(pl.program_id(2) == pl.num_programs(2) - 1)
    def _finalize():
        o_ref[...] = acc_ref[...].astype(o_ref.dtype)


def series_wdk_pallas(A, G, a, X1, X2, *, tm_max=256, tn_max=512, tk_max=2048):
    """SeriesWDK forward.

    A : (L, n_S, d) f32 parameter, G : (L, L) f32 symmetric contact counts
    (fixed buffer), a : scalar, X1 : (n1, L) int32, X2 : (n2, L) int32.
    Returns K : (n1, n2) f32.
    """
    L, n_S, d = A.shape
    n1 = int(X1.shape[0])
    n2 = int(X2.shape[0])

    # ---- static sparse structure of the (fixed) contact matrix -------------
    G_np = np.asarray(jax.device_get(G), dtype=np.float32)
    ls_l, ms_l, ws_l = [], [], []
    for l in range(L):
        for m in range(l, L):
            w = float(G_np[l, m])
            if w != 0.0:
                ls_l.append(l)
                ms_l.append(m)
                ws_l.append(w if l == m else 2.0 * w)   # fold symmetric pair
    T = len(ls_l)
    if T == 0:
        raise ValueError("SeriesWDK requires at least one contact.")
    ls = jnp.asarray(np.array(ls_l, dtype=np.int32))
    ms = jnp.asarray(np.array(ms_l, dtype=np.int32))
    ws = jnp.asarray(np.array(ws_l, dtype=np.float32))

    # ---- gather per-position embeddings (plain JAX, data-dependent) --------
    Li = jnp.arange(L)
    B1 = A[Li[None, :], X1].astype(jnp.float32)      # (n1, L, d)
    B2 = A[Li[None, :], X2].astype(jnp.float32)      # (n2, L, d)

    # ---- hoisted self terms, full f32 ---------------------------------------
    Gj = jnp.asarray(G_np)
    subs1 = jnp.sum(B1 * B1, axis=-1)                              # (n1, L)
    subs2 = jnp.sum(B2 * B2, axis=-1)                              # (n2, L)
    k1 = jnp.einsum("nl,lm,nm->n", subs1, Gj, subs1)               # (n1,)
    k2 = jnp.einsum("nl,lm,nm->n", subs2, Gj, subs2)               # (n2,)
    inv1 = (a * a) * jax.lax.rsqrt(k1)               # a^2 folded into row scale
    inv2 = jax.lax.rsqrt(k2)

    # ---- expanded feature maps:  K = F1 @ F2^T  ------------------------------
    # F1[i,(t,p,q)] = inv1[i]        * B1[i,l_t,p] * B1[i,m_t,q]
    # F2[j,(t,p,q)] = inv2[j] * w_t  * B2[j,l_t,p] * B2[j,m_t,q]
    Kf = T * d * d
    B1l = B1[:, ls, :]                                             # (n1, T, d)
    B1m = B1[:, ms, :]                                             # (n1, T, d)
    F1 = (B1l[:, :, :, None] * B1m[:, :, None, :]).reshape(n1, Kf)
    F1 = (F1 * inv1[:, None]).astype(jnp.bfloat16)                 # bf16 in wrapper

    B2l = B2[:, ls, :]                                             # (n2, T, d)
    B2m = B2[:, ms, :] * ws[None, :, None]                         # weight folded
    F2 = (B2l[:, :, :, None] * B2m[:, :, None, :]).reshape(n2, Kf)
    F2 = (F2 * inv2[:, None]).astype(jnp.bfloat16)

    # ---- tile sizes: bf16 sublane-aligned rows, lane-dense cols / K ----------
    tm = min(tm_max, _round_up(n1, 16))       # mult of 16 (bf16 sublane tile)
    tn = min(tn_max, _round_up(n2, 128))      # lane-dense output / F2 columns
    kf_128 = _round_up(Kf, 128)
    tk = kf_128 if kf_128 <= tk_max else tk_max
    n1p = _round_up(n1, tm)
    n2p = _round_up(n2, tn)
    kfp = _round_up(Kf, tk)

    # Zero padding -> padded rows/cols contribute exactly 0 to the matmul.
    F1p = jnp.zeros((n1p, kfp), jnp.bfloat16).at[:n1, :Kf].set(F1)
    # F2 stored K-major (Kf, n2): lane-dense along n2 — natural MXU weight layout.
    F2p = jnp.zeros((kfp, n2p), jnp.bfloat16).at[:Kf, :n2].set(F2.T)

    gM, gN, gK = n1p // tm, n2p // tn, kfp // tk

    # Put the larger parallel axis first so v7x can shard both TCs; K stays last.
    if gN > gM:
        grid = (gN, gM, gK)
        f1_map = lambda j, i, k: (i, k)
        f2_map = lambda j, i, k: (k, j)
        o_map = lambda j, i, k: (i, j)
    else:
        grid = (gM, gN, gK)
        f1_map = lambda i, j, k: (i, k)
        f2_map = lambda i, j, k: (k, j)
        o_map = lambda i, j, k: (i, j)

    # VMEM budget derived from the real tile footprint (double-buffered inputs
    # and output, plus the f32 accumulator), capped for v7x's 64 MiB VMEM.
    tile_bytes = 2 * (tm * tk * 2 + tk * tn * 2 + tm * tn * 4) + tm * tn * 4
    vmem_limit = int(min(64 * 1024 * 1024, max(2 * tile_bytes, 16 * 1024 * 1024)))

    cost = pl.CostEstimate(
        flops=2 * n1p * n2p * kfp,
        transcendentals=0,
        bytes_accessed=int(n1p * kfp * 2 * gN + kfp * n2p * 2 * gM
                           + n1p * n2p * 4),
    )

    out = pl.pallas_call(
        _wdk_matmul_kernel,
        out_shape=jax.ShapeDtypeStruct((n1p, n2p), jnp.float32),
        grid_spec=pltpu.PrefetchScalarGridSpec(
            num_scalar_prefetch=0,
            grid=grid,
            in_specs=[
                pl.BlockSpec((tm, tk), f1_map),   # F1 tile (bf16, lane-dense K)
                pl.BlockSpec((tk, tn), f2_map),   # F2 tile (bf16, lane-dense N)
            ],
            out_specs=pl.BlockSpec((tm, tn), o_map),
            scratch_shapes=[pltpu.VMEM((tm, tn), jnp.float32)],
        ),
        compiler_params=pltpu.CompilerParams(
            dimension_semantics=("parallel", "parallel", "arbitrary"),
            vmem_limit_bytes=vmem_limit),
        cost_estimate=cost,
    )(F1p, F2p)

    return out[:n1, :n2]


# ----------------------------- glue / reference ------------------------------

def make_adjacency(contacts, L):
    """Symmetric contact-count matrix; equivalent to the padded `graph` +
    zero-column trick in WeightedDecompositionKernel.wdk()."""
    G = np.zeros((L, L), dtype=np.float32)
    for c1, c2 in contacts:
        G[c1, c2] += 1.0
        G[c2, c1] += 1.0
    return jnp.asarray(G)


def series_wdk_reference(A, G, a, X1, X2):
    """Pure-JAX reference mirroring the PyTorch code path (via S = bmm(A,A^T))."""
    L = A.shape[0]
    Li = jnp.arange(L)
    S = jnp.einsum("lsd,ltd->lst", A, A)                              # (L,nS,nS)
    subs1 = S[Li[None, :], X1, X1]                                    # (n1, L)
    subs2 = S[Li[None, :], X2, X2]                                    # (n2, L)
    cross = S[Li[None, None, :], X1[:, None, :], X2[None, :, :]]      # (n1,n2,L)

    def wdk(s):
        return jnp.einsum("...l,lm,...m->...", s, G, s)

    k1 = wdk(subs1)[:, None]
    k2 = wdk(subs2)[None, :]
    K = wdk(cross)
    return (a ** 2) * K / jnp.sqrt(k1) / jnp.sqrt(k2)


if __name__ == "__main__":
    # Small, deterministic problem.
    L, n_S, d = 16, 5, 8
    n1, n2 = 8, 6
    a = 1.25

    # Chain contacts plus a few long-range ones.
    contacts = [(i, i + 1) for i in range(L - 1)] + [(0, L - 1), (2, 7), (4, 11)]
    G = make_adjacency(contacts, L)

    key = jax.random.PRNGKey(0)
    kA, kX1, kX2 = jax.random.split(key, 3)
    A = jax.random.normal(kA, (L, n_S, d), dtype=jnp.float32)         # Parameter A
    X1 = jax.random.randint(kX1, (n1, L), 0, n_S, dtype=jnp.int32)
    X2 = jax.random.randint(kX2, (n2, L), 0, n_S, dtype=jnp.int32)

    K = series_wdk_pallas(A, G, a, X1, X2)
    K = jax.block_until_ready(K)

    K_ref = series_wdk_reference(A, G, a, X1, X2)
    assert K.shape == (n1, n2)
    assert jnp.allclose(K, K_ref, rtol=2e-2, atol=2e-2), (
        f"max abs err {jnp.max(jnp.abs(K - K_ref))}")

    print("KERNEL_OK")
</pallas_src>

<mosaic_0001>
module attributes {stable_mosaic.version = 11 : i64} {
  func.func @_wdk_matmul_kernel(%arg0: i32, %arg1: i32, %arg2: i32, %arg3: memref<16x1152xbf16, #tpu.memory_space<vmem>>, %arg4: memref<1152x128xbf16, #tpu.memory_space<vmem>>, %arg5: memref<16x128xf32, #tpu.memory_space<vmem>>, %arg6: memref<16x128xf32, #tpu.memory_space<vmem>>) attributes {dimension_semantics = [#tpu.dimension_semantics<parallel>, #tpu.dimension_semantics<parallel>, #tpu.dimension_semantics<arbitrary>], iteration_bounds = array<i64: 1, 1, 1>, scalar_prefetch = 0 : i64, scratch_operands = 1 : i64, tpu.core_type = #tpu.core_type<tc>, window_params = [{transform_indices = @transform_0, window_bounds = array<i64: 16, 1152>}, {transform_indices = @transform_1, window_bounds = array<i64: 1152, 128>}, {transform_indices = @transform_2, window_bounds = array<i64: 16, 128>}]} {
    %c0_i32 = arith.constant 0 : i32
    %0 = arith.cmpi eq, %arg2, %c0_i32 : i32
    %1 = arith.extui %0 : i1 to i32
    %c0_i32_0 = arith.constant 0 : i32
    %2 = arith.cmpi ne, %1, %c0_i32_0 : i32
    scf.if %2 {
      %cst_10 = arith.constant 0.000000e+00 : f32
      %12 = vector.broadcast %cst_10 : f32 to vector<16x128xf32>
      %c0_11 = arith.constant 0 : index
      %c0_12 = arith.constant 0 : index
      %13 = vector.load %arg6[%c0_11, %c0_12] : memref<16x128xf32, #tpu.memory_space<vmem>>, vector<16x128xf32>
      tpu.vector_store %arg6[%c0_11, %c0_12], %12 {strides = array<i32>} : memref<16x128xf32, #tpu.memory_space<vmem>>, vector<16x128xf32>,
    } else {
    }
    %c0 = arith.constant 0 : index
    %c0_1 = arith.constant 0 : index
    %3 = vector.load %arg6[%c0, %c0_1] : memref<16x128xf32, #tpu.memory_space<vmem>>, vector<16x128xf32>
    %c0_2 = arith.constant 0 : index
    %c0_3 = arith.constant 0 : index
    %4 = vector.load %arg3[%c0_2, %c0_3] : memref<16x1152xbf16, #tpu.memory_space<vmem>>, vector<16x1152xbf16>
    %c0_4 = arith.constant 0 : index
    %c0_5 = arith.constant 0 : index
    %5 = vector.load %arg4[%c0_4, %c0_5] : memref<1152x128xbf16, #tpu.memory_space<vmem>>, vector<1152x128xbf16>
    %cst = arith.constant dense<0.000000e+00> : vector<16x128xf32>
    %6 = tpu.matmul %4, %5, %cst {dimension_numbers = #tpu.dot_dimension_numbers<[1], [0], [0], [1], [0, 0, 1, 1], [], []>} : vector<16x1152xbf16>, vector<1152x128xbf16>, vector<16x128xf32> -> vector<16x128xf32>
    %7 = arith.addf %3, %6 : vector<16x128xf32>
    %c0_6 = arith.constant 0 : index
    %c0_7 = arith.constant 0 : index
    %8 = vector.load %arg6[%c0_6, %c0_7] : memref<16x128xf32, #tpu.memory_space<vmem>>, vector<16x128xf32>
    tpu.vector_store %arg6[%c0_6, %c0_7], %7 {strides = array<i32>} : memref<16x128xf32, #tpu.memory_space<vmem>>, vector<16x128xf32>,
    %c0_i32_8 = arith.constant 0 : i32
    %9 = arith.cmpi eq, %arg2, %c0_i32_8 : i32
    %10 = arith.extui %9 : i1 to i32
    %c0_i32_9 = arith.constant 0 : i32
    %11 = arith.cmpi ne, %10, %c0_i32_9 : i32
    scf.if %11 {
      %c0_10 = arith.constant 0 : index
      %c0_11 = arith.constant 0 : index
      %12 = vector.load %arg6[%c0_10, %c0_11] : memref<16x128xf32, #tpu.memory_space<vmem>>, vector<16x128xf32>
      %c0_12 = arith.constant 0 : index
      %c0_13 = arith.constant 0 : index
      %13 = vector.load %arg5[%c0_12, %c0_13] : memref<16x128xf32, #tpu.memory_space<vmem>>, vector<16x128xf32>
      tpu.vector_store %arg5[%c0_12, %c0_13], %12 {strides = array<i32>} : memref<16x128xf32, #tpu.memory_space<vmem>>, vector<16x128xf32>,
    } else {
    }
    return
  }
  func.func @transform_0(%arg0: i32, %arg1: i32, %arg2: i32) -> (i32, i32) {
    %c0_i32 = arith.constant 0 : i32
    return %arg0, %arg2 : i32, i32
  }
  func.func @transform_1(%arg0: i32, %arg1: i32, %arg2: i32) -> (i32, i32) {
    %c0_i32 = arith.constant 0 : i32
    return %arg2, %arg1 : i32, i32
  }
  func.func @transform_2(%arg0: i32, %arg1: i32, %arg2: i32) -> (i32, i32) {
    %c0_i32 = arith.constant 0 : i32
    return %arg0, %arg1 : i32, i32
  }
}

</mosaic_0001>

<bundles_post_ra>
// kernel: tpu_custom_call.1
= control target key start
LH: loop header
LB: loop body
LE: loop exit
PB: predicated region body
PF: predicated region fallthrough
CT: control target
= control target key end

     0   :  { %7 = vsyncpa [#allocation4], 0  ;;  %s1310_s0 = inlined_call_operand.hbm [shape: bf16[16,1152], index: 0, kind: input, shape index: {}]   ;;  %s1311_s1 = inlined_call_operand.hbm [shape: bf16[1152,128], index: 1, kind: input, shape index: {}]   ;;  %s1312_s2 = inlined_call_operand.hbm [shape: f32[16,128], index: 2, kind: output, shape index: {}]  }
   0x1   :  { %8 = vsyncpa [#allocation7], 0 }
   0x2   :  { %9 = vsyncpa [#allocation5], 0  ;;  %s1275_s9 = smov [#allocation3]  }
   0x3   :  { %s15_s10 = sshll.u32 %s1275_s9, 4  ;;  %s16_s10 = int_to_ptr.vmem [resolvable:$true] %s15_s10 }
   0x4   :  { %s1217_s11 = scalar_lea.vmem %s16_s10, 1152  ;;  %p1222_p1 = scmp.lt.s32.totalorder %s16_s10, %s16_s10 }
   0x5   :  { %p1218_p0 = scmp.ne.s32.totalorder %s16_s10, %s1217_s11  ;;  %p1223_p2 = scmp.lt.s32.totalorder %s1217_s11, %s1217_s11 }
   0x7   :  { %p1224_p3 = por %p1223_p2, %p1222_p1 }
   0x9   :  { %p1225_p4 = pnand %p1224_p3, %p1218_p0 }
   0xb   :  { %1228 = shalt.err (!%p1225_p4)
}
   0xc   :  { %s1276_s12 = smov 576   ;;  %s1277_s13 = smov 36  }
   0xd   :  { %21 = dma.hbm_to_vmem [thread:$0]  %s1310_s0, 1152, %s16_s10, [#allocation4], %s1276_s12, %s1276_s12, %s1277_s13  }
   0xe   :  { %s1278_s16 = smov [#allocation6]  }
   0xf   :  { %s27_s17 = sshll.u32 %s1278_s16, 4  ;;  %s28_s17 = int_to_ptr.vmem [resolvable:$true] %s27_s17 }
  0x10   :  { %s1237_s18 = scalar_lea.vmem %s28_s17, 9216  ;;  %p1242_p6 = scmp.lt.s32.totalorder %s28_s17, %s28_s17 }
  0x11   :  { %p1238_p5 = scmp.ne.s32.totalorder %s28_s17, %s1237_s18  ;;  %p1243_p7 = scmp.lt.s32.totalorder %s1237_s18, %s1237_s18 }
  0x13   :  { %p1244_p8 = por %p1243_p7, %p1242_p6 }
  0x15   :  { %p1245_p9 = pnand %p1244_p8, %p1238_p5 }
  0x17   :  { %1248 = shalt.err (!%p1245_p9)
}
  0x18   :  { %s1279_s19 = smov 64   ;;  %s1280_s20 = smov 4  }
  0x19   :  { %33 = dma.hbm_to_vmem [thread:$0]  %s1311_s1, 9216, %s28_s17, [#allocation7], %s1279_s19, %s1279_s19, %s1280_s20  }
  0x1a   :  { %1269 = dma.done.wait [#allocation4], 1152  }
  0x1b   :  { %1270 = vsyncadd [#allocation4], 4294966144 }
  0x1c   :  { %1271 = dma.done.wait [#allocation7], 9216  }
  0x1d   :  { %1272 = vsyncadd [#allocation7], 4294958080  ;;  %v1124_v0 = vld [vmem:[#allocation6 + $0x78] sm:$0xff]   ;;  %v1128_v4 = vld [vmem:[#allocation6 + $0x70] sm:$0xff]   ;;  %vm1282_vm0 = vmmov 0   ;;  %s1283_s0 = smov [#allocation8]  }
  0x1e   :  { %v1125_v1 = vld [vmem:[#allocation6 + $0xf8] sm:$0xff]   ;;  %996 = vmatprep.subr.bf16.mxu0 %v1124_v0  ;;  %v1129_v5 = vld [vmem:[#allocation6 + $0xf0] sm:$0xff]   ;;  %v1132_v8 = vld [vmem:[#allocation6 + $0x68] sm:$0xff]   ;;  %s902_s1 = sshll.u32 %s1283_s0, 4  ;;  %s903_s1 = int_to_ptr.vmem [resolvable:$true] %s902_s1 }
  0x1f   :  { %v1126_v2 = vld [vmem:[#allocation6 + $0x38] sm:$0xff]   ;;  %1018 = vmatprep.subr.bf16.mxu1 %v1125_v1  ;;  %v1130_v6 = vld [vmem:[#allocation6 + $0x30] sm:$0xff]   ;;  %v1133_v9 = vld [vmem:[#allocation6 + $0xe8] sm:$0xff]   ;;  %s1249_s23 = scalar_lea.vmem %s903_s1, 256  ;;  %p1254_p11 = scmp.lt.s32.totalorder %s903_s1, %s903_s1 }
  0x20   :  { %v1127_v3 = vld [vmem:[#allocation6 + $0xb8] sm:$0xff]   ;;  %997 = vmatpush3.bf16.msra.mxu0 %v1126_v2  ;;  %v1131_v7 = vld [vmem:[#allocation6 + $0xb0] sm:$0xff]   ;;  %v1134_v10 = vld [vmem:[#allocation6 + $0x28] sm:$0xff]   ;;  %p1250_p10 = scmp.ne.s32.totalorder %s903_s1, %s1249_s23  ;;  %p1255_p12 = scmp.lt.s32.totalorder %s1249_s23, %s1249_s23 }
  0x21   :  { %1019 = vmatpush3.bf16.msra.mxu1 %v1127_v3  ;;  %998 = vmatprep.subr.bf16.mxu0 %v1128_v4  ;;  %v1135_v11 = vld [vmem:[#allocation6 + $0xa8] sm:$0xff]   ;;  %v1136_v12 = vld [vmem:[#allocation6 + $0x60] sm:$0xff]   ;;  %v1140_v16 = vld [vmem:[#allocation6 + $0x58] sm:$0xff]  }
  0x22   :  { %1020 = vmatprep.subr.bf16.mxu1 %v1129_v5  ;;  %v1137_v13 = vld [vmem:[#allocation6 + $0xe0] sm:$0xff]   ;;  %v1141_v17 = vld [vmem:[#allocation6 + $0xd8] sm:$0xff]   ;;  %v1144_v20 = vld [vmem:[#allocation6 + $0x50] sm:$0xff]   ;;  %p1256_p13 = por %p1255_p12, %p1254_p11 }
  0x23   :  { %v1138_v14 = vld [vmem:[#allocation6 + $0x20] sm:$0xff]   ;;  %v1142_v18 = vld [vmem:[#allocation6 + $0x18] sm:$0xff]   ;;  %v1145_v21 = vld [vmem:[#allocation6 + $0xd0] sm:$0xff]  }
  0x24   :  { %999 = vmatpush3.bf16.msra.mxu0 %v1130_v6  ;;  %v1139_v15 = vld [vmem:[#allocation6 + $0xa0] sm:$0xff]   ;;  %v1143_v19 = vld [vmem:[#allocation6 + $0x98] sm:$0xff]   ;;  %v1146_v22 = vld [vmem:[#allocation6 + $0x10] sm:$0xff]   ;;  %v1281_v6 = vmov 0.0   ;;  %p1257_p0 = pnand %p1256_p13, %p1250_p10 }
  0x25   :  { %1021 = vmatpush3.bf16.msra.mxu1 %v1131_v7  ;;  %1000 = vmatprep.subr.bf16.mxu0 %v1132_v8  ;;  %v1147_v23 = vld [vmem:[#allocation6 + $0x90] sm:$0xff]   ;;  %v1148_v24 = vld [vmem:[#allocation6 + $0x48] sm:$0xff]   ;;  %v1152_v28 = vld [vmem:[#allocation6 + $0x40] sm:$0xff]  }
  0x26   :  { %1022 = vmatprep.subr.bf16.mxu1 %v1133_v9  ;;  %v1149_v25 = vld [vmem:[#allocation6 + $0xc8] sm:$0xff]   ;;  %v1153_v29 = vld [vmem:[#allocation6 + $0xc0] sm:$0xff]   ;;  %v1156_v32 = vld [vmem:[#allocation3] ss:$36 sps:$4 sm:$0xff]  }
  0x27   :  { %v1150_v26 = vld [vmem:[#allocation6 + $0x8] sm:$0xff]   ;;  %v1154_v30 = vld [vmem:[#allocation6] sm:$0xff]   ;;  %v1162_v36 = vld [vmem:[#allocation6 + $0x178] sm:$0xff]  }
  0x28   :  { %1001 = vmatpush3.bf16.msra.mxu0 %v1134_v10  ;;  %v1151_v27 = vld [vmem:[#allocation6 + $0x88] sm:$0xff]   ;;  %v1155_v31 = vld [vmem:[#allocation6 + $0x80] sm:$0xff]   ;;  %v1163_v37 = vld [vmem:[#allocation6 + $0x138] sm:$0xff]  }
  0x29   :  { %1023 = vmatpush3.bf16.msra.mxu1 %v1135_v11  ;;  %1002 = vmatprep.subr.bf16.mxu0 %v1136_v12  ;;  %v1158_v33 = vld [vmem:[#allocation3 + $0x4] ss:$36 sps:$4 sm:$0xff]   ;;  %v1161_v35 = vld [vmem:[#allocation3 + $0xc] ss:$36 sps:$4 sm:$0xff]   ;;  %v1166_v40 = vld [vmem:[#allocation6 + $0x170] sm:$0xff]  }
  0x2a   :  { %1024 = vmatprep.subr.bf16.mxu1 %v1137_v13  ;;  %v1159_v34 = vld [vmem:[#allocation3 + $0x8] ss:$36 sps:$4 sm:$0xff]   ;;  %713 = vmatprep.mubr.bf16.mxu0 %v1158_v33  ;;  %v1164_v38 = vld [vmem:[#allocation6 + $0x1f8] sm:$0xff]   ;;  %v1167_v41 = vld [vmem:[#allocation6 + $0x130] sm:$0xff]  }
  0x2b   :  { %754 = vmatprep.mubr.bf16.mxu1 %v1161_v35  ;;  %v1165_v39 = vld [vmem:[#allocation6 + $0x1b8] sm:$0xff]   ;;  %v1168_v42 = vld [vmem:[#allocation6 + $0x1f0] sm:$0xff]   ;;  %v1170_v44 = vld [vmem:[#allocation6 + $0x168] sm:$0xff]  }
  0x2c   :  { %1003 = vmatpush3.bf16.msra.mxu0 %v1138_v14  ;;  %v1169_v43 = vld [vmem:[#allocation6 + $0x1b0] sm:$0xff]   ;;  %v1171_v45 = vld [vmem:[#allocation6 + $0x128] sm:$0xff]   ;;  %v1174_v48 = vld [vmem:[#allocation6 + $0x160] sm:$0xff]  }
  0x2d   :  { %1025 = vmatpush3.bf16.msra.mxu1 %v1139_v15  ;;  %1004 = vmatprep.subr.bf16.mxu0 %v1140_v16  ;;  %v1172_v46 = vld [vmem:[#allocation6 + $0x1e8] sm:$0xff]   ;;  %v1175_v49 = vld [vmem:[#allocation6 + $0x120] sm:$0xff]   ;;  %v1178_v52 = vld [vmem:[#allocation6 + $0x158] sm:$0xff]  }
  0x2e   :  { %1026 = vmatprep.subr.bf16.mxu1 %v1141_v17  ;;  %v1173_v47 = vld [vmem:[#allocation6 + $0x1a8] sm:$0xff]   ;;  %v1176_v50 = vld [vmem:[#allocation6 + $0x1e0] sm:$0xff]   ;;  %v1179_v53 = vld [vmem:[#allocation6 + $0x118] sm:$0xff]  }
  0x2f   :  { %v1177_v51 = vld [vmem:[#allocation6 + $0x1a0] sm:$0xff]   ;;  %v1180_v54 = vld [vmem:[#allocation6 + $0x1d8] sm:$0xff]   ;;  %v1182_v56 = vld [vmem:[#allocation6 + $0x150] sm:$0xff]  }
  0x30   :  { %1005 = vmatpush3.bf16.msra.mxu0 %v1142_v18  ;;  %v1181_v55 = vld [vmem:[#allocation6 + $0x198] sm:$0xff]   ;;  %v1183_v57 = vld [vmem:[#allocation6 + $0x110] sm:$0xff]   ;;  %v1186_v60 = vld [vmem:[#allocation6 + $0x148] sm:$0xff]  }
  0x31   :  { %1027 = vmatpush3.bf16.msra.mxu1 %v1143_v19  ;;  %1006 = vmatprep.subr.bf16.mxu0 %v1144_v20  ;;  %v1184_v58 = vld [vmem:[#allocation6 + $0x1d0] sm:$0xff]   ;;  %v1187_v61 = vld [vmem:[#allocation6 + $0x108] sm:$0xff]   ;;  %v1190_v0 = vld [vmem:[#allocation6 + $0x140] sm:$0xff]  }
  0x32   :  { %1028 = vmatprep.subr.bf16.mxu1 %v1145_v21  ;;  %v1185_v59 = vld [vmem:[#allocation6 + $0x190] sm:$0xff]   ;;  %v1188_v62 = vld [vmem:[#allocation6 + $0x1c8] sm:$0xff]   ;;  %v1191_v1 = vld [vmem:[#allocation6 + $0x100] sm:$0xff]  }
  0x33   :  { %v1189_v63 = vld [vmem:[#allocation6 + $0x188] sm:$0xff]   ;;  %v1192_v2 = vld [vmem:[#allocation6 + $0x1c0] sm:$0xff]   ;;  %v1197_v7 = vld [vmem:[#allocation3 + $0x18] ss:$36 sps:$4 sm:$0xff]  }
  0x34   :  { %1007 = vmatpush3.bf16.msra.mxu0 %v1146_v22  ;;  %v1193_v3 = vld [vmem:[#allocation3 + $0x10] ss:$36 sps:$4 sm:$0xff]   ;;  %v1196_v5 = vld [vmem:[#allocation6 + $0x180] sm:$0xff]   ;;  %v1199_v8 = vld [vmem:[#allocation3 + $0x1c] ss:$36 sps:$4 sm:$0xff]  }
  0x35   :  { %1029 = vmatpush3.bf16.msra.mxu1 %v1147_v23  ;;  %1008 = vmatprep.subr.bf16.mxu0 %v1148_v24  ;;  %v1195_v4 = vld [vmem:[#allocation3 + $0x14] ss:$36 sps:$4 sm:$0xff]   ;;  %v1200_v9 = vld [vmem:[#allocation6 + $0x238] sm:$0xff]   ;;  %v1203_v12 = vld [vmem:[#allocation6 + $0x220] sm:$0xff]  }
  0x36   :  { %1030 = vmatprep.subr.bf16.mxu1 %v1149_v25  ;;  %v1201_v10 = vld [vmem:[#allocation6 + $0x230] sm:$0xff]   ;;  %v1202_v11 = vld [vmem:[#allocation6 + $0x228] sm:$0xff]   ;;  %v1204_v13 = vld [vmem:[#allocation6 + $0x218] sm:$0xff]  }
  0x37   :  { %v1205_v14 = vld [vmem:[#allocation6 + $0x210] sm:$0xff]   ;;  %v1206_v15 = vld [vmem:[#allocation6 + $0x208] sm:$0xff]   ;;  %v1207_v16 = vld [vmem:[#allocation6 + $0x200] sm:$0xff]  }
  0x38   :  { %1009 = vmatpush3.bf16.msra.mxu0 %v1150_v26  ;;  %v1208_v17 = vld [vmem:[#allocation3 + $0x20] ss:$36 sps:$4 sm:$0xff]  }
  0x39   :  { %1031 = vmatpush3.bf16.msra.mxu1 %v1151_v27  ;;  %1010 = vmatprep.subr.bf16.mxu0 %v1152_v28 }
  0x3a   :  { %1032 = vmatprep.subr.bf16.mxu1 %v1153_v29 }
  0x3c   :  { %1011 = vmatpush3.bf16.msra.mxu0 %v1154_v30 }
  0x3d   :  { %1033 = vmatpush3.bf16.msra.mxu1 %v1155_v31  ;;  %1040 = vmatprep.subr.bf16.mxu0 %v1162_v36 }
  0x3e   :  { %1062 = vmatprep.subr.bf16.mxu1 %v1164_v38 }
  0x3f   :  { %714 = vmatmul.mubr.bf16.vlgmr.msra.gmra.mxu0 %v1156_v32 }
  0x40   :  { %755 = vmatmul.mubr.bf16.vlgmr.msra.gmra.mxu1 %v1159_v34  ;;  %1041 = vmatpush3.bf16.msra.mxu0 %v1163_v37 }
  0x41   :  { %1063 = vmatpush3.bf16.msra.mxu1 %v1165_v39  ;;  %1042 = vmatprep.subr.bf16.mxu0 %v1166_v40 }
  0x42   :  { %1064 = vmatprep.subr.bf16.mxu1 %v1168_v42  ;;  %795 = vmatprep.mubr.bf16.mxu0 %v1195_v4 }
  0x43   :  { %836 = vmatprep.mubr.bf16.mxu1 %v1199_v8 }
  0x44   :  { %1043 = vmatpush3.bf16.msra.mxu0 %v1167_v41 }
  0x45   :  { %1065 = vmatpush3.bf16.msra.mxu1 %v1169_v43  ;;  %1044 = vmatprep.subr.bf16.mxu0 %v1170_v44 }
  0x46   :  { %1066 = vmatprep.subr.bf16.mxu1 %v1172_v46 }
  0x48   :  { %1045 = vmatpush3.bf16.msra.mxu0 %v1171_v45 }
  0x49   :  { %1067 = vmatpush3.bf16.msra.mxu1 %v1173_v47  ;;  %1046 = vmatprep.subr.bf16.mxu0 %v1174_v48 }
  0x4a   :  { %1068 = vmatprep.subr.bf16.mxu1 %v1176_v50 }
  0x4c   :  { %1047 = vmatpush3.bf16.msra.mxu0 %v1175_v49 }
  0x4d   :  { %1069 = vmatpush3.bf16.msra.mxu1 %v1177_v51  ;;  %1048 = vmatprep.subr.bf16.mxu0 %v1178_v52 }
  0x4e   :  { %1070 = vmatprep.subr.bf16.mxu1 %v1180_v54 }
  0x50   :  { %1049 = vmatpush3.bf16.msra.mxu0 %v1179_v53 }
  0x51   :  { %1071 = vmatpush3.bf16.msra.mxu1 %v1181_v55  ;;  %1050 = vmatprep.subr.bf16.mxu0 %v1182_v56 }
  0x52   :  { %1072 = vmatprep.subr.bf16.mxu1 %v1184_v58 }
  0x54   :  { %1051 = vmatpush3.bf16.msra.mxu0 %v1183_v57 }
  0x55   :  { %1073 = vmatpush3.bf16.msra.mxu1 %v1185_v59  ;;  %1052 = vmatprep.subr.bf16.mxu0 %v1186_v60 }
  0x56   :  { %1074 = vmatprep.subr.bf16.mxu1 %v1188_v62 }
  0x58   :  { %1053 = vmatpush3.bf16.msra.mxu0 %v1187_v61 }
  0x59   :  { %1075 = vmatpush3.bf16.msra.mxu1 %v1189_v63  ;;  %1054 = vmatprep.subr.bf16.mxu0 %v1190_v0 }
  0x5a   :  { %1076 = vmatprep.subr.bf16.mxu1 %v1192_v2 }
  0x5c   :  { %1055 = vmatpush3.bf16.msra.mxu0 %v1191_v1 }
  0x5d   :  { %1093 = vmatprep.subr.bf16.mxu0 %v1281_v6  ;;  %1077 = vmatpush3.bf16.msra.mxu1 %v1196_v5 }
  0x5f   :  { %796 = vmatmul.mubr.bf16.vlgmr.msra.gmra.mxu0 %v1193_v3 }
  0x60   :  { %1109 = vmatprep.mubr.msk.bf16.mxu0 %vm1282_vm0, %v1281_v6  ;;  %1094 = vmatpush3.bf16.msra.mxu0 %v1200_v9 }
  0x61   :  { %837 = vmatmul.mubr.bf16.vlgmr.msra.gmra.mxu1 %v1197_v7  ;;  %1095 = vmatprep.subr.bf16.mxu0 %v1281_v6 }
  0x64   :  { %1096 = vmatpush3.bf16.msra.mxu0 %v1201_v10 }
  0x65   :  { %1097 = vmatprep.subr.bf16.mxu0 %v1281_v6 }
  0x68   :  { %1098 = vmatpush3.bf16.msra.mxu0 %v1202_v11 }
  0x69   :  { %1099 = vmatprep.subr.bf16.mxu0 %v1281_v6 }
  0x6c   :  { %1100 = vmatpush3.bf16.msra.mxu0 %v1203_v12 }
  0x6d   :  { %1101 = vmatprep.subr.bf16.mxu0 %v1281_v6 }
  0x70   :  { %1102 = vmatpush3.bf16.msra.mxu0 %v1204_v13 }
  0x71   :  { %1103 = vmatprep.subr.bf16.mxu0 %v1281_v6 }
  0x74   :  { %1104 = vmatpush3.bf16.msra.mxu0 %v1205_v14 }
  0x75   :  { %1105 = vmatprep.subr.bf16.mxu0 %v1281_v6 }
  0x78   :  { %1106 = vmatpush3.bf16.msra.mxu0 %v1206_v15 }
  0x79   :  { %1107 = vmatprep.subr.bf16.mxu0 %v1281_v6 }
  0x7c   :  { %1108 = vmatpush3.bf16.msra.mxu0 %v1207_v16 }
  0x7f   :  { %1110 = vmatmul.mubr.bf16.vlgmr.msra.gmra.mxu0 %v1208_v17 }
  0xff   :  { %v1012_v18 = vpop.f32.mrf.mxu0 }
 0x100   :  { %v1034_v19 = vpop.f32.mrf.mxu1 }
 0x101   :  { %v1013_v20 = vpop.f32.mrf.mxu0 }
 0x102   :  { %v1035_v21 = vpop.f32.mrf.mxu1  ;;  %v1014_v31 = vadd.f32 %v1013_v20, %v1012_v18 }
 0x103   :  { %v1015_v22 = vpop.f32.mrf.mxu0  ;;  %v1036_v32 = vadd.f32 %v1035_v21, %v1034_v19 }
 0x104   :  { %v1037_v23 = vpop.f32.mrf.mxu1 }
 0x105   :  { %v1016_v24 = vpop.f32.mrf.mxu0  ;;  %v757_v36 = vadd.f32 %v1036_v32, %v1014_v31 }
 0x106   :  { %v1038_v26 = vpop.f32.mrf.mxu1  ;;  %v1017_v37 = vadd.f32 %v1016_v24, %v1015_v22 }
 0x107   :  { %v1039_v38 = vadd.f32 %v1038_v26, %v1037_v23 }
 0x109   :  { %v760_v43 = vadd.f32 %v1039_v38, %v1017_v37 }
 0x11f   :  { %v1056_v25 = vpop.f32.mrf.mxu0 }
 0x121   :  { %v1057_v27 = vpop.f32.mrf.mxu0  ;;  %v1078_v28 = vpop.f32.mrf.mxu1 }
 0x122   :  { %v1058_v33 = vadd.f32 %v1057_v27, %v1056_v25 }
 0x123   :  { %v1059_v29 = vpop.f32.mrf.mxu0  ;;  %v1079_v30 = vpop.f32.mrf.mxu1 }
 0x124   :  { %v798_v39 = vadd.f32 %v1058_v33, %v757_v36  ;;  %v1080_v40 = vadd.f32 %v1079_v30, %v1078_v28 }
 0x125   :  { %v1060_v34 = vpop.f32.mrf.mxu0  ;;  %v1081_v35 = vpop.f32.mrf.mxu1 }
 0x126   :  { %v1061_v41 = vadd.f32 %v1060_v34, %v1059_v29  ;;  %v839_v46 = vadd.f32 %v1080_v40, %v798_v39 }
 0x127   :  { %v1082_v42 = vpop.f32.mrf.mxu1 }
 0x128   :  { %v801_v44 = vadd.f32 %v1061_v41, %v760_v43  ;;  %v1083_v45 = vadd.f32 %v1082_v42, %v1081_v35 }
 0x12a   :  { %v842_v50 = vadd.f32 %v1083_v45, %v801_v44 }
 0x13f   :  { %v879_v47 = vpop.f32.mrf.mxu0 }
 0x140   :  { %v880_v48 = vadd.f32 %v879_v47, %v839_v46 }
 0x141   :  { %v1111_v49 = vpop.f32.mrf.mxu0 }
 0x142   :  { %895 = vst [vmem:[#allocation8] sm:$0xff] %v880_v48 }
 0x143   :  { %v882_v51 = vpop.f32.mrf.mxu0 }
 0x144   :  { %v883_v52 = vadd.f32 %v882_v51, %v842_v50 }
 0x145   :  { %v1112_v53 = vpop.f32.mrf.mxu0 }
 0x146   :  { %896 = vst [vmem:[#allocation8 + $0x8] sm:$0xff] %v883_v52 }
 0x147   :  { %1260 = shalt.err (!%p1257_p0)
}
 0x148   :  { %s1284_s24 = smov 128   ;;  %s1285_s25 = smov 8  }
 0x149   :  { %908 = dma.vmem_to_hbm [thread:$0]  %s903_s1, 256, %s1312_s2, [#allocation5], %s1284_s24, %s1284_s24, %s1285_s25  }
 0x14a   :  { %1273 = dma.done.wait [#allocation5], 256  }
 0x14b   :  { %1274 = vsyncadd [#allocation5], 4294967040 }
 0x14c   :  { %912 = vsyncpa [#allocation4], 1 }
 0x14d   :  { %913 = vsyncpa [#allocation7], 1 }
 0x14e   :  { %914 = vsyncpa [#allocation5], 1 }

</bundles_post_ra>
